<compile_context>
chip_gen: v7x
topology: tpu7x:2x2x1
jax: 0.10.0
libtpu: 0.0.40
codegen_flags: <defaults>
</compile_context>

<pallas_src>
import functools

import jax
import jax.numpy as jnp
from jax import lax
from jax.experimental import pallas as pl
from jax.experimental.pallas import tpu as pltpu


def _round_up(x: int, m: int) -> int:
    return ((x + m - 1) // m) * m


def _pointwise_conv_kernel(x_ref, w_ref, b_ref, o_ref, *, chunk_rows):
    """Per-voxel channel contraction on one dense voxel tile.

    x_ref : (Cin, R, 128)  VMEM   activation tile (voxels dense on sublanes+lanes)
    w_ref : (Cout, Cin)    SMEM   conv weights (scalars)
    b_ref : (Cout,)        SMEM   bias (scalars)
    o_ref : (Cout, R, 128) VMEM   output tile
    """
    cin, rows, _ = x_ref.shape
    cout = o_ref.shape[0]

    # Hoist all SMEM scalar reads once, outside the chunk loop.
    w = [[w_ref[co, ci] for ci in range(cin)] for co in range(cout)]
    b = [b_ref[co] for co in range(cout)]

    def do_chunk(r0, nrows):
        # Load each input channel's (nrows, 128) slab once.
        xs = [x_ref[ci, pl.ds(r0, nrows), :].astype(jnp.float32)
              for ci in range(cin)]
        # Unrolled VPU FMAs: out[co] = sum_ci w[co, ci] * x[ci] + b[co]
        for co in range(cout):
            acc = xs[0] * w[co][0]
            for ci in range(1, cin):
                acc = acc + xs[ci] * w[co][ci]
            acc = acc + b[co]
            o_ref[co, pl.ds(r0, nrows), :] = acc.astype(o_ref.dtype)

    n_full = rows // chunk_rows
    rem = rows - n_full * chunk_rows

    if n_full > 0:
        # Vreg-sized chunks keep the working set small (no spills); unrolled
        # so the LLO scheduler sees the whole stream.
        def body(c, carry):
            do_chunk(pl.multiple_of(c * chunk_rows, chunk_rows), chunk_rows)
            return carry

        lax.fori_loop(0, n_full, body, 0, unroll=True)
    if rem > 0:
        # Static tail chunk (only when the block's row count < chunk_rows,
        # e.g. tiny spatial sizes).
        do_chunk(n_full * chunk_rows, rem)


@functools.partial(jax.jit, static_argnames=("r_tile_cap", "chunk_rows"))
def uoutput_forward(x_ncdhw, weight, bias, *, r_tile_cap=256, chunk_rows=32):
    """1x1x1 Conv3d over NCDHW input (UOutput forward).

    x_ncdhw : (N, Cin, D, H, W)
    weight  : (Cout, Cin, 1, 1, 1) PyTorch Conv3d weight (or already (Cout, Cin))
    bias    : (Cout,)
    returns : (N, Cout, D, H, W)
    """
    N, Cin, D, H, W = x_ncdhw.shape
    w2 = weight.reshape(weight.shape[0], -1)          # (Cout, Cin) for k=1
    Cout, Cin_w = w2.shape
    assert Cin_w == Cin, "weight in_channels mismatch"

    DHW = D * H * W
    LANE = 128

    # Channels-first voxel matrix, then fold the voxel axis into
    # (rows, 128) so both sublanes and lanes are dense.
    x = x_ncdhw.reshape(N, Cin, DHW)
    DHW_128 = _round_up(DHW, LANE)
    if DHW_128 != DHW:
        # TODO(synk): ragged DHW (not a multiple of 128) takes one small
        # pad-to-128 copy; a fully copy-free ragged path would need masked
        # edge lanes in-kernel.  Common UNet heads (8^3, 16^3, 128^3, ...)
        # never hit this branch.
        x = jnp.pad(x, ((0, 0), (0, 0), (0, DHW_128 - DHW)))
    Rtot = DHW_128 // LANE
    x = x.reshape(N, Cin, Rtot, LANE)

    # Row-tile: up to r_tile_cap rows (256 * 128 = 32768 voxels, ~0.5 MiB of
    # f32 input per channel-block; double-buffered blocks stay far below the
    # VMEM limit on every generation, including v7x's 64 MiB).
    if Rtot <= r_tile_cap:
        r_tile = Rtot            # full axis => always layout-legal
    else:
        r_tile = r_tile_cap      # multiple of 8 (and 16 for bf16)
    n_vtiles = pl.cdiv(Rtot, r_tile)   # ragged tail handled by block padding

    w_smem = w2.astype(jnp.float32)    # (Cout, Cin) scalars in SMEM
    b_smem = bias.astype(jnp.float32)  # (Cout,)     scalars in SMEM

    kernel = functools.partial(_pointwise_conv_kernel, chunk_rows=chunk_rows)

    out = pl.pallas_call(
        kernel,
        out_shape=jax.ShapeDtypeStruct((N, Cout, Rtot, LANE), x.dtype),
        grid_spec=pltpu.PrefetchScalarGridSpec(
            num_scalar_prefetch=0,
            grid=(N, n_vtiles),
            in_specs=[
                # Dense activation block: (Cin, r_tile, 128).
                pl.BlockSpec((None, Cin, r_tile, LANE),
                             lambda n, v: (n, 0, v, 0)),
                # Weights / bias: tiny scalar tables, resident in SMEM.
                pl.BlockSpec(memory_space=pltpu.MemorySpace.SMEM),
                pl.BlockSpec(memory_space=pltpu.MemorySpace.SMEM),
            ],
            out_specs=pl.BlockSpec((None, Cout, r_tile, LANE),
                                   lambda n, v: (n, 0, v, 0)),
        ),
        compiler_params=pltpu.CompilerParams(
            dimension_semantics=("parallel", "parallel"),
        ),
    )(x, w_smem, b_smem)

    out = out.reshape(N, Cout, DHW_128)
    if DHW_128 != DHW:
        out = out[:, :, :DHW]
    return out.reshape(N, Cout, D, H, W)


if __name__ == "__main__":
    # Small shapes consistent with a UNet3D head: batch=2, in_ch=4, n_class=3,
    # spatial 8x8x8.  The PyTorch module receives a list of feature maps and
    # uses only x[-1]; we model that single tensor.
    N, in_ch, n_class = 2, 4, 3
    Dd = Hh = Ww = 8

    key = jax.random.PRNGKey(0)
    kx, kw, kb = jax.random.split(key, 3)

    x_last = jax.random.normal(kx, (N, in_ch, Dd, Hh, Ww), dtype=jnp.float32)
    # Conv3d(in_ch, n_class, kernel_size=1) parameter shapes.
    weight = jax.random.normal(kw, (n_class, in_ch, 1, 1, 1), dtype=jnp.float32) * 0.1
    bias = jax.random.normal(kb, (n_class,), dtype=jnp.float32) * 0.1

    # Emulate the module input: a list of feature maps, use the last one.
    x_list = [x_last]

    out = uoutput_forward(x_list[-1], weight, bias)
    out = jax.block_until_ready(out)

    # Reference check in plain JAX (same math as Conv3d 1x1x1).
    w2 = weight.reshape(n_class, in_ch)
    ref = jnp.einsum("ncdhw,oc->nodhw", x_last, w2) + bias[None, :, None, None, None]
    assert out.shape == (N, n_class, Dd, Hh, Ww)
    assert jnp.allclose(out, ref, atol=1e-5, rtol=1e-5)

    print("KERNEL_OK")
</pallas_src>

<mosaic_0001>
module attributes {stable_mosaic.version = 11 : i64} {
  func.func @_pointwise_conv_kernel(%arg0: i32, %arg1: i32, %arg2: memref<1x4x4x128xf32, #tpu.memory_space<vmem>>, %arg3: memref<3x4xf32, #tpu.memory_space<smem>>, %arg4: memref<3xf32, #tpu.memory_space<smem>>, %arg5: memref<1x3x4x128xf32, #tpu.memory_space<vmem>>) attributes {dimension_semantics = [#tpu.dimension_semantics<parallel>, #tpu.dimension_semantics<parallel>], iteration_bounds = array<i64: 2, 1>, scalar_prefetch = 0 : i64, scratch_operands = 0 : i64, tpu.core_type = #tpu.core_type<tc>, window_params = [{transform_indices = @transform_0, window_bounds = array<i64: 1, 4, 4, 128>}, {transform_indices = @transform_1, window_bounds = array<i64: 3, 4>}, {transform_indices = @transform_2, window_bounds = array<i64: 3>}, {transform_indices = @transform_3, window_bounds = array<i64: 1, 3, 4, 128>}]} {
    %c0 = arith.constant 0 : index
    %c0_0 = arith.constant 0 : index
    %0 = memref.load %arg3[%c0, %c0_0] : memref<3x4xf32, #tpu.memory_space<smem>>
    %c0_1 = arith.constant 0 : index
    %c1 = arith.constant 1 : index
    %1 = memref.load %arg3[%c0_1, %c1] : memref<3x4xf32, #tpu.memory_space<smem>>
    %c0_2 = arith.constant 0 : index
    %c2 = arith.constant 2 : index
    %2 = memref.load %arg3[%c0_2, %c2] : memref<3x4xf32, #tpu.memory_space<smem>>
    %c0_3 = arith.constant 0 : index
    %c3 = arith.constant 3 : index
    %3 = memref.load %arg3[%c0_3, %c3] : memref<3x4xf32, #tpu.memory_space<smem>>
    %c1_4 = arith.constant 1 : index
    %c0_5 = arith.constant 0 : index
    %4 = memref.load %arg3[%c1_4, %c0_5] : memref<3x4xf32, #tpu.memory_space<smem>>
    %c1_6 = arith.constant 1 : index
    %c1_7 = arith.constant 1 : index
    %5 = memref.load %arg3[%c1_6, %c1_7] : memref<3x4xf32, #tpu.memory_space<smem>>
    %c1_8 = arith.constant 1 : index
    %c2_9 = arith.constant 2 : index
    %6 = memref.load %arg3[%c1_8, %c2_9] : memref<3x4xf32, #tpu.memory_space<smem>>
    %c1_10 = arith.constant 1 : index
    %c3_11 = arith.constant 3 : index
    %7 = memref.load %arg3[%c1_10, %c3_11] : memref<3x4xf32, #tpu.memory_space<smem>>
    %c2_12 = arith.constant 2 : index
    %c0_13 = arith.constant 0 : index
    %8 = memref.load %arg3[%c2_12, %c0_13] : memref<3x4xf32, #tpu.memory_space<smem>>
    %c2_14 = arith.constant 2 : index
    %c1_15 = arith.constant 1 : index
    %9 = memref.load %arg3[%c2_14, %c1_15] : memref<3x4xf32, #tpu.memory_space<smem>>
    %c2_16 = arith.constant 2 : index
    %c2_17 = arith.constant 2 : index
    %10 = memref.load %arg3[%c2_16, %c2_17] : memref<3x4xf32, #tpu.memory_space<smem>>
    %c2_18 = arith.constant 2 : index
    %c3_19 = arith.constant 3 : index
    %11 = memref.load %arg3[%c2_18, %c3_19] : memref<3x4xf32, #tpu.memory_space<smem>>
    %c0_20 = arith.constant 0 : index
    %12 = memref.load %arg4[%c0_20] : memref<3xf32, #tpu.memory_space<smem>>
    %c1_21 = arith.constant 1 : index
    %13 = memref.load %arg4[%c1_21] : memref<3xf32, #tpu.memory_space<smem>>
    %c2_22 = arith.constant 2 : index
    %14 = memref.load %arg4[%c2_22] : memref<3xf32, #tpu.memory_space<smem>>
    %c0_23 = arith.constant 0 : index
    %c0_24 = arith.constant 0 : index
    %c0_25 = arith.constant 0 : index
    %c0_26 = arith.constant 0 : index
    %15 = vector.load %arg2[%c0_23, %c0_24, %c0_25, %c0_26] : memref<1x4x4x128xf32, #tpu.memory_space<vmem>>, vector<1x1x4x128xf32>
    %16 = vector.shape_cast %15 : vector<1x1x4x128xf32> to vector<4x128xf32>
    %c0_27 = arith.constant 0 : index
    %c1_28 = arith.constant 1 : index
    %c0_29 = arith.constant 0 : index
    %c0_30 = arith.constant 0 : index
    %17 = vector.load %arg2[%c0_27, %c1_28, %c0_29, %c0_30] : memref<1x4x4x128xf32, #tpu.memory_space<vmem>>, vector<1x1x4x128xf32>
    %18 = vector.shape_cast %17 : vector<1x1x4x128xf32> to vector<4x128xf32>
    %c0_31 = arith.constant 0 : index
    %c2_32 = arith.constant 2 : index
    %c0_33 = arith.constant 0 : index
    %c0_34 = arith.constant 0 : index
    %19 = vector.load %arg2[%c0_31, %c2_32, %c0_33, %c0_34] : memref<1x4x4x128xf32, #tpu.memory_space<vmem>>, vector<1x1x4x128xf32>
    %20 = vector.shape_cast %19 : vector<1x1x4x128xf32> to vector<4x128xf32>
    %c0_35 = arith.constant 0 : index
    %c3_36 = arith.constant 3 : index
    %c0_37 = arith.constant 0 : index
    %c0_38 = arith.constant 0 : index
    %21 = vector.load %arg2[%c0_35, %c3_36, %c0_37, %c0_38] : memref<1x4x4x128xf32, #tpu.memory_space<vmem>>, vector<1x1x4x128xf32>
    %22 = vector.shape_cast %21 : vector<1x1x4x128xf32> to vector<4x128xf32>
    %23 = vector.broadcast %0 : f32 to vector<4x128xf32>
    %24 = arith.mulf %16, %23 : vector<4x128xf32>
    %25 = vector.broadcast %1 : f32 to vector<4x128xf32>
    %26 = arith.mulf %18, %25 : vector<4x128xf32>
    %27 = arith.addf %24, %26 : vector<4x128xf32>
    %28 = vector.broadcast %2 : f32 to vector<4x128xf32>
    %29 = arith.mulf %20, %28 : vector<4x128xf32>
    %30 = arith.addf %27, %29 : vector<4x128xf32>
    %31 = vector.broadcast %3 : f32 to vector<4x128xf32>
    %32 = arith.mulf %22, %31 : vector<4x128xf32>
    %33 = arith.addf %30, %32 : vector<4x128xf32>
    %34 = vector.broadcast %12 : f32 to vector<4x128xf32>
    %35 = arith.addf %33, %34 : vector<4x128xf32>
    %c0_39 = arith.constant 0 : index
    %c0_40 = arith.constant 0 : index
    %c0_41 = arith.constant 0 : index
    %c0_42 = arith.constant 0 : index
    %36 = vector.load %arg5[%c0_39, %c0_40, %c0_41, %c0_42] : memref<1x3x4x128xf32, #tpu.memory_space<vmem>>, vector<1x1x4x128xf32>
    %37 = vector.shape_cast %36 : vector<1x1x4x128xf32> to vector<4x128xf32>
    %38 = vector.shape_cast %35 : vector<4x128xf32> to vector<1x1x4x128xf32>
    tpu.vector_store %arg5[%c0_39, %c0_40, %c0_41, %c0_42], %38 {strides = array<i32>} : memref<1x3x4x128xf32, #tpu.memory_space<vmem>>, vector<1x1x4x128xf32>,
    %39 = vector.broadcast %4 : f32 to vector<4x128xf32>
    %40 = arith.mulf %16, %39 : vector<4x128xf32>
    %41 = vector.broadcast %5 : f32 to vector<4x128xf32>
    %42 = arith.mulf %18, %41 : vector<4x128xf32>
    %43 = arith.addf %40, %42 : vector<4x128xf32>
    %44 = vector.broadcast %6 : f32 to vector<4x128xf32>
    %45 = arith.mulf %20, %44 : vector<4x128xf32>
    %46 = arith.addf %43, %45 : vector<4x128xf32>
    %47 = vector.broadcast %7 : f32 to vector<4x128xf32>
    %48 = arith.mulf %22, %47 : vector<4x128xf32>
    %49 = arith.addf %46, %48 : vector<4x128xf32>
    %50 = vector.broadcast %13 : f32 to vector<4x128xf32>
    %51 = arith.addf %49, %50 : vector<4x128xf32>
    %c0_43 = arith.constant 0 : index
    %c1_44 = arith.constant 1 : index
    %c0_45 = arith.constant 0 : index
    %c0_46 = arith.constant 0 : index
    %52 = vector.load %arg5[%c0_43, %c1_44, %c0_45, %c0_46] : memref<1x3x4x128xf32, #tpu.memory_space<vmem>>, vector<1x1x4x128xf32>
    %53 = vector.shape_cast %52 : vector<1x1x4x128xf32> to vector<4x128xf32>
    %54 = vector.shape_cast %51 : vector<4x128xf32> to vector<1x1x4x128xf32>
    tpu.vector_store %arg5[%c0_43, %c1_44, %c0_45, %c0_46], %54 {strides = array<i32>} : memref<1x3x4x128xf32, #tpu.memory_space<vmem>>, vector<1x1x4x128xf32>,
    %55 = vector.broadcast %8 : f32 to vector<4x128xf32>
    %56 = arith.mulf %16, %55 : vector<4x128xf32>
    %57 = vector.broadcast %9 : f32 to vector<4x128xf32>
    %58 = arith.mulf %18, %57 : vector<4x128xf32>
    %59 = arith.addf %56, %58 : vector<4x128xf32>
    %60 = vector.broadcast %10 : f32 to vector<4x128xf32>
    %61 = arith.mulf %20, %60 : vector<4x128xf32>
    %62 = arith.addf %59, %61 : vector<4x128xf32>
    %63 = vector.broadcast %11 : f32 to vector<4x128xf32>
    %64 = arith.mulf %22, %63 : vector<4x128xf32>
    %65 = arith.addf %62, %64 : vector<4x128xf32>
    %66 = vector.broadcast %14 : f32 to vector<4x128xf32>
    %67 = arith.addf %65, %66 : vector<4x128xf32>
    %c0_47 = arith.constant 0 : index
    %c2_48 = arith.constant 2 : index
    %c0_49 = arith.constant 0 : index
    %c0_50 = arith.constant 0 : index
    %68 = vector.load %arg5[%c0_47, %c2_48, %c0_49, %c0_50] : memref<1x3x4x128xf32, #tpu.memory_space<vmem>>, vector<1x1x4x128xf32>
    %69 = vector.shape_cast %68 : vector<1x1x4x128xf32> to vector<4x128xf32>
    %70 = vector.shape_cast %67 : vector<4x128xf32> to vector<1x1x4x128xf32>
    tpu.vector_store %arg5[%c0_47, %c2_48, %c0_49, %c0_50], %70 {strides = array<i32>} : memref<1x3x4x128xf32, #tpu.memory_space<vmem>>, vector<1x1x4x128xf32>,
    return
  }
  func.func @transform_0(%arg0: i32, %arg1: i32) -> (i32, i32, i32, i32) {
    %c0_i32 = arith.constant 0 : i32
    %c0_i32_0 = arith.constant 0 : i32
    %c0_i32_1 = arith.constant 0 : i32
    return %arg0, %c0_i32, %arg1, %c0_i32_0 : i32, i32, i32, i32
  }
  func.func @transform_1(%arg0: i32, %arg1: i32) -> (i32, i32) {
    %c0_i32 = arith.constant 0 : i32
    %c0_i32_0 = arith.constant 0 : i32
    %c0_i32_1 = arith.constant 0 : i32
    return %c0_i32, %c0_i32_0 : i32, i32
  }
  func.func @transform_2(%arg0: i32, %arg1: i32) -> i32 {
    %c0_i32 = arith.constant 0 : i32
    %c0_i32_0 = arith.constant 0 : i32
    return %c0_i32 : i32
  }
  func.func @transform_3(%arg0: i32, %arg1: i32) -> (i32, i32, i32, i32) {
    %c0_i32 = arith.constant 0 : i32
    %c0_i32_0 = arith.constant 0 : i32
    %c0_i32_1 = arith.constant 0 : i32
    return %arg0, %c0_i32, %arg1, %c0_i32_0 : i32, i32, i32, i32
  }
}

</mosaic_0001>

<bundles_post_ra>
// kernel: uoutput_forward.1
= control target key start
LH: loop header
LB: loop body
LE: loop exit
PB: predicated region body
PF: predicated region fallthrough
CT: control target
= control target key end

     0   :  { %8 = vsyncpa [#allocation3], 0  ;;  %s650_s0 = inlined_call_operand.vmem [shape: f32[2,4,4,128], index: 0, kind: input, shape index: {}]   ;;  %s651_s1 = inlined_call_operand.vmem [shape: f32[3,4], index: 1, kind: input, shape index: {}]   ;;  %s652_s2 = inlined_call_operand.vmem [shape: f32[3], index: 2, kind: input, shape index: {}]   ;;  %s653_s3 = inlined_call_operand.vmem [shape: f32[2,3,4,128], index: 3, kind: output, shape index: {}]  }
   0x1   :  { %9 = vsyncpa [#allocation5], 0  ;;  %s564_s12 = smov 0   ;;  %s566_s13 = smov 0  }
   0x2   :  { %s568_s14 = smov 0  }
   0x3 LB: > { %s401_s15 = sadd.s32 4294967295, %s540_s14   ;;  %s27_s16 = sadd.s32 1, %s536_s13  ;;  %s540_s14 = sphi %s568_s14, %s15_s14   ;;  %s536_s13 = sphi %s566_s13, %s663_s13   ;;  %s532_s12 = sphi %s564_s12, %s662_s12  }
   0x4   : > { %p29_p0 = scmp.ge.s32.totalorder %s27_s16, 2  ;;  %p403_p1 = scmp.ge.s32.totalorder %s540_s14, 1 }
   0x5   : > { %p130_p2 = scmp.lt.s32.totalorder %s540_s14, 3  ;;  %p589_p4 = scmp.eq.s32.totalorder %s401_s15, 0 }
   0x6   : > { %s665_s16 = smov (%p29_p0, %s27_s16), 0  ;;  %s143_s21 = sshll.u32 %s651_s1, 4  ;;  %s144_s21 = int_to_ptr.vmem [resolvable:$true] %s143_s21 }
   0x7   : > { %p585_p3 = pnand %p403_p1, %p130_p2  ;;  %s154_s24 = sshll.u32 %s652_s2, 4  ;;  %s155_s24 = int_to_ptr.vmem [resolvable:$true] %s154_s24 }
   0x8   : > { %s658_s18 = scalar_select %p589_p4, 1, 0 }
   0x9   : > { %s657_s17 = scalar_select %p585_p3, 1, 0 }
   0xa   : > { %p443_p5 = pneg %p585_p3  ;;  %s480_s26 = scalar_lea.vmem %s144_s21, 64 }
   0xb   : > { %p481_p7 = scmp.ne.s32.totalorder %s144_s21, %s480_s26  ;;  %p488_p11 = scmp.lt.s32.totalorder %s144_s21, %s144_s21 }
   0xc   : > { %p603_p6 = pnand %p589_p4, %p443_p5  ;;  %p489_p12 = scmp.lt.s32.totalorder %s480_s26, %s480_s26 }
   0xe   : > { %p482_p8 = pneg %p603_p6  ;;  %p490_p13 = por %p489_p12, %p488_p11 }
  0x10   : > { %p483_p9 = pnand %p482_p8, %p481_p7 }
  0x12   : > { %p484_p10 = pneg %p483_p9 }
  0x14   : > { %p491_p0 = pnand %p490_p13, %p484_p10 }
  0x16   : > { %494 = shalt.err (!%p491_p0)
}
  0x17   : > { %s542_s27 = smov [#allocation2]   ;;  %s495_s28 = scalar_lea.vmem %s155_s24, 16 }
  0x18   : > { %446 = dma.vmem_to_smem (!%p603_p6), %s144_s21, 64, %s542_s27, [#allocation3]  }
  0x19   : > { %p496_p1 = scmp.ne.s32.totalorder %s155_s24, %s495_s28  ;;  %p503_p4 = scmp.lt.s32.totalorder %s155_s24, %s155_s24 }
  0x1a   : > { %p504_p3 = scmp.lt.s32.totalorder %s495_s28, %s495_s28 }
  0x1b   : > { %p498_p2 = pnand %p496_p1, %p482_p8 }
  0x1c   : > { %p505_p7 = por %p504_p3, %p503_p4 }
  0x1d   : > { %p499_p5 = pneg %p498_p2 }
  0x1f   : > { %p506_p9 = pnand %p505_p7, %p499_p5 }
  0x21   : > { %509 = shalt.err (!%p506_p9)
}
  0x22   : > { %s543_s29 = smov [#allocation4]   ;;  %p660_p10 = scmp.ne.s32.totalorder %s657_s17, 0 }
  0x23   : > { %449 = dma.vmem_to_smem (!%p603_p6), %s155_s24, 16, %s543_s29, [#allocation5]  }
  0x24   : > { %178 = sbr.rel (%p660_p10) target bundleno = 74 (0x4a), region = 32  ;;  %p661_p11 = scmp.ne.s32.totalorder (!%p660_p10), %s658_s18, 0 }
  0x2b   : > { %523 = dma.done.wait (%p661_p11), [#allocation3], 64  }
  0x2c   : > { %525 = vsyncadd (%p661_p11), [#allocation3], 4294967232 }
  0x2d   : > { %527 = dma.done.wait (%p661_p11), [#allocation5], 16  }
  0x2e   : > { %529 = vsyncadd (%p661_p11), [#allocation5], 4294967280 }
  0x2f   : > { %188 = sfence }
  0x30   : > { %p213_p3 = scmp.lt.s32.totalorder %s532_s12, 1  ;;  %s229_s30 = sld [smem:[#allocation2]] }
  0x31   : > { %s413_s4 = sld [smem:[#allocation2 + $0x1]]  ;;  %s414_s5 = sld [smem:[#allocation2 + $0x2]] }
  0x32   : > { %s667_s12 = smov (!%p213_p3, %s532_s12), 1  ;;  %s415_s6 = sld [smem:[#allocation2 + $0x3]] }
  0x33   : > { %s433_s7 = sshll.u32 %s667_s12, 4  ;;  %s628_s8 = sld [smem:[#allocation4]] }
  0x34   : > { %s220_s11 = scalar_lea.vmem %s650_s0, %s433_s7  ;;  %s416_s15 = sld [smem:[#allocation2 + $0x80]] }
  0x35   : > { %v244_v0 = vld [vmem:[%s220_s11] sm:$0xf]  ;;  %v426_v1 = vld [vmem:[%s220_s11 + $0x4] sm:$0xf]  ;;  %v427_v2 = vld [vmem:[%s220_s11 + $0x8] sm:$0xf] }
  0x36   : > { %v251_v3 = vstv %s229_s30  ;;  %v428_v4 = vld [vmem:[%s220_s11 + $0xc] sm:$0xf]  ;;  %s417_s17 = sld [smem:[#allocation2 + $0x81]]  ;;  %s418_s18 = sld [smem:[#allocation2 + $0x82]] }
  0x37   : > { %v252_v5 = vmul.f32 %v251_v3, %v244_v0  ;;  %v253_v6 = vstv %s413_s4  ;;  %v256_v7 = vstv %s414_s5  ;;  %s419_s19 = sld [smem:[#allocation2 + $0x83]]  ;;  %s420_s20 = sld [smem:[#allocation2 + $0x100]] }
  0x38   : > { %v254_v8 = vmul.f32 %v426_v1, %v253_v6  ;;  %v257_v9 = vmul.f32 %v427_v2, %v256_v7  ;;  %v259_v10 = vstv %s415_s6  ;;  %s421_s21 = sld [smem:[#allocation2 + $0x101]]  ;;  %s422_s22 = sld [smem:[#allocation2 + $0x102]] }
  0x39   : > { %v260_v12 = vmul.f32 %v428_v4, %v259_v10  ;;  %s423_s23 = sld [smem:[#allocation2 + $0x103]]  ;;  %s434_s24 = smul.u32 12, %s667_s12  ;;  %v262_v16 = vstv %s628_s8 }
  0x3a   : > { %v255_v11 = vadd.f32 %v254_v8, %v252_v5  ;;  %s634_s25 = sld [smem:[#allocation4 + $0x1]]  ;;  %v265_v13 = vstv %s416_s15  ;;  %s425_s26 = sld [smem:[#allocation4 + $0x2]] }
  0x3b   : > { %v266_v15 = vmul.f32 %v265_v13, %v244_v0  ;;  %s228_s29 = scalar_lea.vmem %s653_s3, %s434_s24 }
  0x3c   : > { %v258_v14 = vadd.f32 %v257_v9, %v255_v11  ;;  %v267_v17 = vstv %s417_s17  ;;  %v270_v18 = vstv %s418_s18 }
  0x3d   : > { %v268_v20 = vmul.f32 %v426_v1, %v267_v17  ;;  %v271_v21 = vmul.f32 %v427_v2, %v270_v18  ;;  %v273_v22 = vstv %s419_s19  ;;  %v280_v24 = vstv %s420_s20 }
  0x3e   : > { %v261_v19 = vadd.f32 %v260_v12, %v258_v14  ;;  %v274_v23 = vmul.f32 %v428_v4, %v273_v22  ;;  %v282_v25 = vstv %s421_s21  ;;  %v281_v28 = vmul.f32 %v280_v24, %v244_v0 }
  0x3f   : > { %v269_v27 = vadd.f32 %v268_v20, %v266_v15  ;;  %v283_v29 = vmul.f32 %v426_v1, %v282_v25  ;;  %v285_v30 = vstv %s422_s22  ;;  %v288_v31 = vstv %s423_s23 }
  0x40   : > { %v263_v26 = vadd.f32 %v262_v16, %v261_v19  ;;  %v286_v34 = vmul.f32 %v427_v2, %v285_v30  ;;  %v289_v35 = vmul.f32 %v428_v4, %v288_v31  ;;  %v276_v36 = vstv %s634_s25 }
  0x41   : > { %v272_v32 = vadd.f32 %v271_v21, %v269_v27  ;;  %v284_v33 = vadd.f32 %v283_v29, %v281_v28  ;;  %v291_v39 = vstv %s425_s26 }
  0x42   : > { %264 = vst [vmem:[%s228_s29] sm:$0xf] %v263_v26 }
  0x43   : > { %v275_v37 = vadd.f32 %v274_v23, %v272_v32  ;;  %v287_v38 = vadd.f32 %v286_v34, %v284_v33 }
  0x45   : > { %v277_v40 = vadd.f32 %v276_v36, %v275_v37  ;;  %v290_v41 = vadd.f32 %v289_v35, %v287_v38 }
  0x47   : > { %429 = vst [vmem:[%s228_s29 + $0x4] sm:$0xf] %v277_v40  ;;  %v292_v42 = vadd.f32 %v291_v39, %v290_v41 }
  0x49   : > { %430 = vst [vmem:[%s228_s29 + $0x8] sm:$0xf] %v292_v42 }
  0x4a PF: > { %s15_s14 = sadd.s32 1, %s540_s14   ;;  %s662_s12 = smov %s536_s13 }
  0x4b   : > { %p12_p4 = scmp.ge.s32.totalorder %s15_s14, 4   ;;  %s663_s13 = smov %s665_s16 }
  0x4d   :  { %14 = sbr.rel (!%p12_p4) target bundleno = 3 (0x3), region = 76 }
  0x54   :  { %322 = vsyncpa [#allocation3], 1 }
  0x55   :  { %324 = vsyncpa [#allocation3 + $0x1], 1 }
  0x56   :  { %325 = vsyncpa [#allocation5], 1 }

</bundles_post_ra>
